<compile_context>
chip_gen: v5e
topology: v5e:2x2
jax: 0.10.0
libtpu: 0.0.40
codegen_flags: <defaults>
</compile_context>

<pallas_src>
import functools

import jax
import jax.numpy as jnp
from jax.experimental import pallas as pl
from jax.experimental.pallas import tpu as pltpu

D = 256            # propagation_mlp feature width (fixed by the module)
_MAX_TILE_M = 2048  # x + out double-buffered ~8 MiB + 0.5 MiB weights: fits every gen (incl. v7x)


def _round_up(n, m):
    return ((n + m - 1) // m) * m


def _pick_tile_m(n):
    if n >= _MAX_TILE_M:
        return _MAX_TILE_M
    if n >= 512:
        # >= 2 tiles so a v7x megacore can use both TensorCores; 256-row groups
        # keep the v6e/v7x 2x256^2 systolic array full.
        return min(_round_up(pl.cdiv(n, 2), 256), _MAX_TILE_M)
    # Single tile for small N; 128 granule (v5e 4x128 MXU / f32 sublanes)
    # bounds masked-row waste instead of rounding all the way to a big tile.
    return _round_up(n, 128)


def _mlp_kernel(x_ref, w1_ref, b1_ref, w2_ref, b2_ref, o_ref):
    """Fused Linear(256,256) -> ReLU -> Linear(256,256) on one (tile_m, 256) tile."""
    w1 = w1_ref[...]
    w2 = w2_ref[...]
    # First linear on the MXU, f32 accumulation.
    h = jnp.dot(x_ref[...].astype(w1.dtype), w1, preferred_element_type=jnp.float32)
    # Bias + ReLU in f32 on the VPU (biases are (1, 256); one broadcast per tile).
    h = jnp.maximum(h + b1_ref[...].astype(jnp.float32), 0.0)
    # Second linear.  With f32 weights the intermediate stays f32 (matches the
    # f32 PyTorch MLP); with bf16 weights it takes the bf16 MXU fast path.
    y = jnp.dot(h.astype(w2.dtype), w2, preferred_element_type=jnp.float32)
    y = y + b2_ref[...].astype(jnp.float32)
    o_ref[...] = y.astype(o_ref.dtype)


@functools.partial(jax.jit, static_argnames=("tile_m",))
def _fused_mlp(x, w1, b1, w2, b2, *, tile_m):
    n = x.shape[0]
    grid_m = pl.cdiv(n, tile_m)
    return pl.pallas_call(
        _mlp_kernel,
        out_shape=jax.ShapeDtypeStruct((n, D), x.dtype),
        grid=(grid_m,),
        in_specs=[
            pl.BlockSpec((tile_m, D), lambda i: (i, 0)),        # x: streams by row tile
            pl.BlockSpec(memory_space=pltpu.MemorySpace.VMEM),  # W1: whole, resident, single-buffered
            pl.BlockSpec(memory_space=pltpu.MemorySpace.VMEM),  # b1
            pl.BlockSpec(memory_space=pltpu.MemorySpace.VMEM),  # W2
            pl.BlockSpec(memory_space=pltpu.MemorySpace.VMEM),  # b2
        ],
        out_specs=pl.BlockSpec((tile_m, D), lambda i: (i, 0)),
        compiler_params=pltpu.CompilerParams(
            # Only claim megacore parallelism when there is actually >1 tile.
            dimension_semantics=("parallel" if grid_m > 1 else "arbitrary",),
        ),
    )(x, w1, b1, w2, b2)


def propagation_mlp(x, w1, b1, w2, b2, *, weight_dtype=None):
    """Apply the fused propagation MLP: x [N, 256] -> [N, 256].

    w1, w2: [256, 256] stored [D_in, D_out]; b1, b2: [256].
    weight_dtype=jnp.bfloat16 opts into halved weight DMA / native bf16 MXU
    rate at the cost of bf16 rounding vs. the f32 PyTorch module.
    """
    n, d = x.shape
    assert d == D, f"propagation_mlp expects feature dim {D}, got {d}"
    if n == 0:
        return jnp.zeros((0, D), x.dtype)
    if weight_dtype is not None:
        w1 = w1.astype(weight_dtype)
        w2 = w2.astype(weight_dtype)
    return _fused_mlp(
        x, w1, b1.reshape(1, D), w2, b2.reshape(1, D), tile_m=_pick_tile_m(n)
    )


if __name__ == "__main__":
    key = jax.random.PRNGKey(0)
    k_x, k_w1, k_b1, k_w2, k_b2 = jax.random.split(key, 5)

    # Small, module-consistent shapes: N = 20 track-query embeddings of width 256.
    n = 20
    scale = 1.0 / jnp.sqrt(jnp.float32(D))
    x = jax.random.normal(k_x, (n, D), jnp.float32)
    w1 = jax.random.normal(k_w1, (D, D), jnp.float32) * scale
    b1 = jax.random.normal(k_b1, (D,), jnp.float32) * scale
    w2 = jax.random.normal(k_w2, (D, D), jnp.float32) * scale
    b2 = jax.random.normal(k_b2, (D,), jnp.float32) * scale

    # 1) f32 path — matches PyTorch nn.Sequential(Linear, ReLU, Linear) numerics.
    out = jax.block_until_ready(propagation_mlp(x, w1, b1, w2, b2))
    ref = jnp.maximum(x @ w1 + b1, 0.0) @ w2 + b2
    assert out.shape == (n, D)
    assert jnp.allclose(out, ref, atol=1e-4, rtol=1e-4), float(
        jnp.max(jnp.abs(out - ref))
    )

    # 2) Opt-in bf16-weight fast path (halves the weight DMA bytes).
    out_bf16 = jax.block_until_ready(
        propagation_mlp(x, w1, b1, w2, b2, weight_dtype=jnp.bfloat16)
    )
    xb = x.astype(jnp.bfloat16).astype(jnp.float32)
    w1b = w1.astype(jnp.bfloat16).astype(jnp.float32)
    w2b = w2.astype(jnp.bfloat16).astype(jnp.float32)
    hb = jnp.maximum(xb @ w1b + b1, 0.0).astype(jnp.bfloat16).astype(jnp.float32)
    ref_bf16 = hb @ w2b + b2
    assert jnp.allclose(out_bf16, ref_bf16, atol=5e-2, rtol=5e-2), float(
        jnp.max(jnp.abs(out_bf16 - ref_bf16))
    )

    # 3) Larger (non-multiple-of-tile) N: exercises multi-tile grid, megacore
    #    'parallel' semantics, and the masked ragged last block.
    n2 = 1025
    x2 = jax.random.normal(k_x, (n2, D), jnp.float32)
    out2 = jax.block_until_ready(propagation_mlp(x2, w1, b1, w2, b2))
    ref2 = jnp.maximum(x2 @ w1 + b1, 0.0) @ w2 + b2
    assert out2.shape == (n2, D)
    assert jnp.allclose(out2, ref2, atol=1e-4, rtol=1e-4), float(
        jnp.max(jnp.abs(out2 - ref2))
    )

    print("KERNEL_OK")
</pallas_src>

<mosaic_0001>
module attributes {stable_mosaic.version = 11 : i64} {
  func.func @_mlp_kernel(%arg0: i32, %arg1: memref<128x256xf32, #tpu.memory_space<vmem>>, %arg2: memref<256x256xf32, #tpu.memory_space<vmem>>, %arg3: memref<1x256xf32, #tpu.memory_space<vmem>>, %arg4: memref<256x256xf32, #tpu.memory_space<vmem>>, %arg5: memref<1x256xf32, #tpu.memory_space<vmem>>, %arg6: memref<128x256xf32, #tpu.memory_space<vmem>>) attributes {dimension_semantics = [#tpu.dimension_semantics<arbitrary>], iteration_bounds = array<i64: 1>, scalar_prefetch = 0 : i64, scratch_operands = 0 : i64, tpu.core_type = #tpu.core_type<tc>, window_params = [{transform_indices = @transform_0, window_bounds = array<i64: 128, 256>}, {pipeline_mode = #tpu.pipeline_mode<synchronous>, transform_indices = @transform_1, window_bounds = array<i64: 256, 256>}, {pipeline_mode = #tpu.pipeline_mode<synchronous>, transform_indices = @transform_2, window_bounds = array<i64: 1, 256>}, {pipeline_mode = #tpu.pipeline_mode<synchronous>, transform_indices = @transform_3, window_bounds = array<i64: 256, 256>}, {pipeline_mode = #tpu.pipeline_mode<synchronous>, transform_indices = @transform_4, window_bounds = array<i64: 1, 256>}, {transform_indices = @transform_5, window_bounds = array<i64: 128, 256>}]} {
    %c0 = arith.constant 0 : index
    %c0_0 = arith.constant 0 : index
    %0 = vector.load %arg2[%c0, %c0_0] : memref<256x256xf32, #tpu.memory_space<vmem>>, vector<256x256xf32>
    %c0_1 = arith.constant 0 : index
    %c0_2 = arith.constant 0 : index
    %1 = vector.load %arg4[%c0_1, %c0_2] : memref<256x256xf32, #tpu.memory_space<vmem>>, vector<256x256xf32>
    %c0_3 = arith.constant 0 : index
    %c0_4 = arith.constant 0 : index
    %2 = vector.load %arg1[%c0_3, %c0_4] : memref<128x256xf32, #tpu.memory_space<vmem>>, vector<128x256xf32>
    %cst = arith.constant dense<0.000000e+00> : vector<128x256xf32>
    %3 = tpu.matmul %2, %0, %cst {dimension_numbers = #tpu.dot_dimension_numbers<[1], [0], [0], [1], [0, 0, 1, 1], [], []>} : vector<128x256xf32>, vector<256x256xf32>, vector<128x256xf32> -> vector<128x256xf32>
    %c0_5 = arith.constant 0 : index
    %c0_6 = arith.constant 0 : index
    %4 = vector.load %arg3[%c0_5, %c0_6] : memref<1x256xf32, #tpu.memory_space<vmem>>, vector<1x256xf32>
    %5 = vector.broadcast %4 : vector<1x256xf32> to vector<128x256xf32>
    %6 = arith.addf %3, %5 : vector<128x256xf32>
    %cst_7 = arith.constant 0.000000e+00 : f32
    %7 = vector.broadcast %cst_7 : f32 to vector<128x256xf32>
    %8 = arith.maximumf %6, %7 : vector<128x256xf32>
    %cst_8 = arith.constant dense<0.000000e+00> : vector<128x256xf32>
    %9 = tpu.matmul %8, %1, %cst_8 {dimension_numbers = #tpu.dot_dimension_numbers<[1], [0], [0], [1], [0, 0, 1, 1], [], []>} : vector<128x256xf32>, vector<256x256xf32>, vector<128x256xf32> -> vector<128x256xf32>
    %c0_9 = arith.constant 0 : index
    %c0_10 = arith.constant 0 : index
    %10 = vector.load %arg5[%c0_9, %c0_10] : memref<1x256xf32, #tpu.memory_space<vmem>>, vector<1x256xf32>
    %11 = vector.broadcast %10 : vector<1x256xf32> to vector<128x256xf32>
    %12 = arith.addf %9, %11 : vector<128x256xf32>
    %c0_11 = arith.constant 0 : index
    %c0_12 = arith.constant 0 : index
    %13 = vector.load %arg6[%c0_11, %c0_12] : memref<128x256xf32, #tpu.memory_space<vmem>>, vector<128x256xf32>
    tpu.vector_store %arg6[%c0_11, %c0_12], %12 {strides = array<i32>} : memref<128x256xf32, #tpu.memory_space<vmem>>, vector<128x256xf32>,
    return
  }
  func.func @transform_0(%arg0: i32) -> (i32, i32) {
    %c0_i32 = arith.constant 0 : i32
    %c0_i32_0 = arith.constant 0 : i32
    return %arg0, %c0_i32 : i32, i32
  }
  func.func @transform_1(%arg0: i32) -> (i32, i32) {
    %c0_i32 = arith.constant 0 : i32
    %c0_i32_0 = arith.constant 0 : i32
    %c0_i32_1 = arith.constant 0 : i32
    return %c0_i32, %c0_i32_0 : i32, i32
  }
  func.func @transform_2(%arg0: i32) -> (i32, i32) {
    %c0_i32 = arith.constant 0 : i32
    %c0_i32_0 = arith.constant 0 : i32
    %c0_i32_1 = arith.constant 0 : i32
    return %c0_i32, %c0_i32_0 : i32, i32
  }
  func.func @transform_3(%arg0: i32) -> (i32, i32) {
    %c0_i32 = arith.constant 0 : i32
    %c0_i32_0 = arith.constant 0 : i32
    %c0_i32_1 = arith.constant 0 : i32
    return %c0_i32, %c0_i32_0 : i32, i32
  }
  func.func @transform_4(%arg0: i32) -> (i32, i32) {
    %c0_i32 = arith.constant 0 : i32
    %c0_i32_0 = arith.constant 0 : i32
    %c0_i32_1 = arith.constant 0 : i32
    return %c0_i32, %c0_i32_0 : i32, i32
  }
  func.func @transform_5(%arg0: i32) -> (i32, i32) {
    %c0_i32 = arith.constant 0 : i32
    %c0_i32_0 = arith.constant 0 : i32
    return %arg0, %c0_i32 : i32, i32
  }
}

</mosaic_0001>

<bundles_post_ra>
// kernel: _fused_mlp.1
= control target key start
LH: loop header
LB: loop body
LE: loop exit
PB: predicated region body
PF: predicated region fallthrough
CT: control target
= control target key end

     0   :  { %10 = vsyncpa [#allocation3], 0  ;;  %s1133_s0 = inlined_call_operand.hbm [shape: f32[20,256], index: 0, kind: input, shape index: {}]   ;;  %s1134_s1 = inlined_call_operand.hbm [shape: f32[256,256], index: 1, kind: input, shape index: {}]   ;;  %s1135_s2 = inlined_call_operand.hbm [shape: f32[1,256], index: 2, kind: input, shape index: {}]   ;;  %s1136_s3 = inlined_call_operand.hbm [shape: f32[256,256], index: 3, kind: input, shape index: {}]   ;;  %s1137_s4 = inlined_call_operand.vmem [shape: f32[1,256], index: 4, kind: input, shape index: {}]   ;;  %s1138_s5 = inlined_call_operand.hbm [shape: f32[20,256], index: 5, kind: output, shape index: {}]  }
   0x1   :  { %11 = vsyncpa [#allocation6], 0 }
   0x2   :  { %12 = vsyncpa [#allocation9], 0 }
   0x3   :  { %13 = vsyncpa [#allocation4], 0 }
   0x4   :  { %17 = vsyncadd [#allocation3], 3328  ;;  %s31_s20 = sshll.u32 %s1134_s1, 4  ;;  %s994_s21 = smov [#allocation5]   ;;  %s32_s20 = int_to_ptr.hbm [resolvable:$true] %s31_s20 }
   0x5   :  { %s33_s22 = sshll.u32 %s994_s21, 4  ;;  %s18_s25 = sshll.u32 %s1133_s0, 4  ;;  %s34_s22 = int_to_ptr.vmem [resolvable:$true] %s33_s22  ;;  %s19_s25 = int_to_ptr.hbm [resolvable:$true] %s18_s25 }
   0x6   :  { %s995_s26 = smov 256   ;;  %s996_s27 = smov 16  }
   0x7   :  { %39 = dma.hbm_to_vmem [thread:$0]  %s32_s20, 8192, %s34_s22, [#allocation6], %s995_s26, %s995_s26, %s996_s27  }
   0x8   :  { %s997_s28 = smov [#allocation2]   ;;  %s45_s1 = sshll.u32 %s1135_s2, 4  ;;  %s46_s1 = int_to_ptr.hbm [resolvable:$true] %s45_s1 }
   0x9   :  { %s20_s29 = sshll.u32 %s997_s28, 4  ;;  %s55_s8 = sshll.u32 %s1136_s3, 4  ;;  %s21_s29 = int_to_ptr.vmem [resolvable:$true] %s20_s29  ;;  %s56_s8 = int_to_ptr.hbm [resolvable:$true] %s55_s8 }
   0xa   :  { %26 = dma.hbm_to_vmem [thread:$0]  %s19_s25, 768, %s21_s29, [#allocation3], %s995_s26, %s995_s26, %s996_s27  }
   0xb   :  { %s998_s9 = smov [#allocation7]   ;;  %s999_s11 = smov [#allocation8]  }
   0xc   :  { %s47_s10 = sshll.u32 %s998_s9, 4  ;;  %s57_s12 = sshll.u32 %s999_s11, 4  ;;  %s48_s10 = int_to_ptr.vmem [resolvable:$true] %s47_s10  ;;  %s58_s12 = int_to_ptr.vmem [resolvable:$true] %s57_s12 }
   0xd   :  { %50 = dma.hbm_to_vmem [thread:$0]  %s46_s1, 32, %s48_s10, [#allocation6]  }
   0xe   :  { %63 = dma.hbm_to_vmem [thread:$0]  %s56_s8, 8192, %s58_s12, [#allocation9], %s995_s26, %s995_s26, %s996_s27  }
   0xf   :  { %986 = dma.done.wait [#allocation3], 4096  }
  0x10   :  { %987 = vsyncadd [#allocation3], 4294963200 }
  0x11   :  { %988 = dma.done.wait [#allocation6], 8224  }
  0x12   :  { %989 = vsyncadd [#allocation6], 4294959072 }
  0x13   :  { %990 = dma.done.wait [#allocation9], 8192  }
  0x14   :  { %991 = vsyncadd [#allocation9], 4294959104  ;;  %v113_v0 = vld [vmem:[#allocation5 + $0xf8] sm:$0xff]  ;;  %v111_v1 = vld [vmem:[#allocation5 + $0xe8] sm:$0xff] }
  0x15   :  { %v145_v2 = vld [vmem:[#allocation5 + $0x1f8] sm:$0xff]  ;;  %378 = vmatpush.msra.mxu2 %v113_v0  ;;  %v112_v3 = vld [vmem:[#allocation5 + $0xf0] sm:$0xff]  ;;  %v143_v4 = vld [vmem:[#allocation5 + $0x1e8] sm:$0xff] }
  0x16   :  { %443 = vmatpush.msra.mxu3 %v145_v2  ;;  %248 = vmatpush.msra.mxu0 %v112_v3  ;;  %v109_v5 = vld [vmem:[#allocation5 + $0xd8] sm:$0xff]  ;;  %v110_v6 = vld [vmem:[#allocation5 + $0xe0] sm:$0xff]  ;;  %v144_v7 = vld [vmem:[#allocation5 + $0x1f0] sm:$0xff] }
  0x17   :  { %379 = vmatpush.msra.mxu2 %v111_v1  ;;  %v141_v8 = vld [vmem:[#allocation5 + $0x1d8] sm:$0xff]  ;;  %v108_v9 = vld [vmem:[#allocation5 + $0xd0] sm:$0xff]  ;;  %v142_v10 = vld [vmem:[#allocation5 + $0x1e0] sm:$0xff]  ;;  %313 = vmatpush.msra.mxu1 %v144_v7 }
  0x18   :  { %444 = vmatpush.msra.mxu3 %v143_v4  ;;  %249 = vmatpush.msra.mxu0 %v110_v6  ;;  %v107_v11 = vld [vmem:[#allocation5 + $0xc8] sm:$0xff]  ;;  %v106_v13 = vld [vmem:[#allocation5 + $0xc0] sm:$0xff]  ;;  %v140_v14 = vld [vmem:[#allocation5 + $0x1d0] sm:$0xff] }
  0x19   :  { %v139_v12 = vld [vmem:[#allocation5 + $0x1c8] sm:$0xff]  ;;  %380 = vmatpush.msra.mxu2 %v109_v5  ;;  %314 = vmatpush.msra.mxu1 %v142_v10  ;;  %v105_v15 = vld [vmem:[#allocation5 + $0xb8] sm:$0xff]  ;;  %v104_v17 = vld [vmem:[#allocation5 + $0xb0] sm:$0xff] }
  0x1a   :  { %445 = vmatpush.msra.mxu3 %v141_v8  ;;  %250 = vmatpush.msra.mxu0 %v108_v9  ;;  %v137_v16 = vld [vmem:[#allocation5 + $0x1b8] sm:$0xff]  ;;  %v138_v18 = vld [vmem:[#allocation5 + $0x1c0] sm:$0xff]  ;;  %v103_v19 = vld [vmem:[#allocation5 + $0xa8] sm:$0xff] }
  0x1b   :  { %381 = vmatpush.msra.mxu2 %v107_v11  ;;  %315 = vmatpush.msra.mxu1 %v140_v14  ;;  %v135_v20 = vld [vmem:[#allocation5 + $0x1a8] sm:$0xff]  ;;  %v102_v21 = vld [vmem:[#allocation5 + $0xa0] sm:$0xff]  ;;  %v136_v22 = vld [vmem:[#allocation5 + $0x1b0] sm:$0xff] }
  0x1c   :  { %446 = vmatpush.msra.mxu3 %v139_v12  ;;  %251 = vmatpush.msra.mxu0 %v106_v13  ;;  %v101_v23 = vld [vmem:[#allocation5 + $0x98] sm:$0xff]  ;;  %v100_v25 = vld [vmem:[#allocation5 + $0x90] sm:$0xff]  ;;  %v134_v26 = vld [vmem:[#allocation5 + $0x1a0] sm:$0xff] }
  0x1d   :  { %382 = vmatpush.msra.mxu2 %v105_v15  ;;  %316 = vmatpush.msra.mxu1 %v138_v18  ;;  %v133_v24 = vld [vmem:[#allocation5 + $0x198] sm:$0xff]  ;;  %v99_v27 = vld [vmem:[#allocation5 + $0x88] sm:$0xff]  ;;  %v98_v29 = vld [vmem:[#allocation5 + $0x80] sm:$0xff] }
  0x1e   :  { %447 = vmatpush.msra.mxu3 %v137_v16  ;;  %252 = vmatpush.msra.mxu0 %v104_v17  ;;  %v131_v28 = vld [vmem:[#allocation5 + $0x188] sm:$0xff]  ;;  %v132_v30 = vld [vmem:[#allocation5 + $0x190] sm:$0xff]  ;;  %v97_v31 = vld [vmem:[#allocation5 + $0x78] sm:$0xff] }
  0x1f   :  { %383 = vmatpush.msra.mxu2 %v103_v19  ;;  %317 = vmatpush.msra.mxu1 %v136_v22  ;;  %v129_v32 = vld [vmem:[#allocation5 + $0x178] sm:$0xff]  ;;  %v96_v33 = vld [vmem:[#allocation5 + $0x70] sm:$0xff]  ;;  %v130_v34 = vld [vmem:[#allocation5 + $0x180] sm:$0xff] }
  0x20   :  { %448 = vmatpush.msra.mxu3 %v135_v20  ;;  %253 = vmatpush.msra.mxu0 %v102_v21  ;;  %v95_v35 = vld [vmem:[#allocation5 + $0x68] sm:$0xff]  ;;  %v94_v37 = vld [vmem:[#allocation5 + $0x60] sm:$0xff]  ;;  %v128_v38 = vld [vmem:[#allocation5 + $0x170] sm:$0xff] }
  0x21   :  { %384 = vmatpush.msra.mxu2 %v101_v23  ;;  %318 = vmatpush.msra.mxu1 %v134_v26  ;;  %v127_v36 = vld [vmem:[#allocation5 + $0x168] sm:$0xff]  ;;  %v93_v39 = vld [vmem:[#allocation5 + $0x58] sm:$0xff]  ;;  %v92_v41 = vld [vmem:[#allocation5 + $0x50] sm:$0xff] }
  0x22   :  { %449 = vmatpush.msra.mxu3 %v133_v24  ;;  %254 = vmatpush.msra.mxu0 %v100_v25  ;;  %v125_v40 = vld [vmem:[#allocation5 + $0x158] sm:$0xff]  ;;  %v126_v42 = vld [vmem:[#allocation5 + $0x160] sm:$0xff]  ;;  %v91_v43 = vld [vmem:[#allocation5 + $0x48] sm:$0xff] }
  0x23   :  { %385 = vmatpush.msra.mxu2 %v99_v27  ;;  %319 = vmatpush.msra.mxu1 %v132_v30  ;;  %v123_v44 = vld [vmem:[#allocation5 + $0x148] sm:$0xff]  ;;  %v90_v45 = vld [vmem:[#allocation5 + $0x40] sm:$0xff]  ;;  %v124_v46 = vld [vmem:[#allocation5 + $0x150] sm:$0xff] }
  0x24   :  { %450 = vmatpush.msra.mxu3 %v131_v28  ;;  %255 = vmatpush.msra.mxu0 %v98_v29  ;;  %v89_v47 = vld [vmem:[#allocation5 + $0x38] sm:$0xff]  ;;  %v88_v49 = vld [vmem:[#allocation5 + $0x30] sm:$0xff]  ;;  %v122_v50 = vld [vmem:[#allocation5 + $0x140] sm:$0xff] }
  0x25   :  { %386 = vmatpush.msra.mxu2 %v97_v31  ;;  %320 = vmatpush.msra.mxu1 %v130_v34  ;;  %v121_v48 = vld [vmem:[#allocation5 + $0x138] sm:$0xff]  ;;  %v87_v51 = vld [vmem:[#allocation5 + $0x28] sm:$0xff]  ;;  %v86_v53 = vld [vmem:[#allocation5 + $0x20] sm:$0xff] }
  0x26   :  { %451 = vmatpush.msra.mxu3 %v129_v32  ;;  %256 = vmatpush.msra.mxu0 %v96_v33  ;;  %v119_v52 = vld [vmem:[#allocation5 + $0x128] sm:$0xff]  ;;  %v120_v54 = vld [vmem:[#allocation5 + $0x130] sm:$0xff]  ;;  %v85_v55 = vld [vmem:[#allocation5 + $0x18] sm:$0xff] }
  0x27   :  { %387 = vmatpush.msra.mxu2 %v95_v35  ;;  %321 = vmatpush.msra.mxu1 %v128_v38  ;;  %v117_v56 = vld [vmem:[#allocation5 + $0x118] sm:$0xff]  ;;  %v84_v57 = vld [vmem:[#allocation5 + $0x10] sm:$0xff]  ;;  %v118_v58 = vld [vmem:[#allocation5 + $0x120] sm:$0xff] }
  0x28   :  { %452 = vmatpush.msra.mxu3 %v127_v36  ;;  %257 = vmatpush.msra.mxu0 %v94_v37  ;;  %v83_v59 = vld [vmem:[#allocation5 + $0x8] sm:$0xff]  ;;  %v210_v61 = vld [vmem:[#allocation2] sm:$0xff]  ;;  %v116_v0 = vld [vmem:[#allocation5 + $0x110] sm:$0xff] }
  0x29   :  { %388 = vmatpush.msra.mxu2 %v93_v39  ;;  %322 = vmatpush.msra.mxu1 %v126_v42  ;;  %v115_v60 = vld [vmem:[#allocation5 + $0x108] sm:$0xff]  ;;  %v82_v63 = vld [vmem:[#allocation5] sm:$0xff]  ;;  %v176_v4 = vld [vmem:[#allocation8 + $0xf0] sm:$0xff] }
  0x2a   :  { %453 = vmatpush.msra.mxu3 %v125_v40  ;;  %258 = vmatpush.msra.mxu0 %v92_v41  ;;  %v211_v62 = vld [vmem:[#allocation2 + $0x8] sm:$0xff]  ;;  %v177_v1 = vld [vmem:[#allocation8 + $0xf8] sm:$0xff]  ;;  %v208_v5 = vld [vmem:[#allocation8 + $0x1f0] sm:$0xff] }
  0x2b   :  { %389 = vmatpush.msra.mxu2 %v91_v43  ;;  %323 = vmatpush.msra.mxu1 %v124_v46  ;;  %v114_v2 = vld [vmem:[#allocation5 + $0x100] sm:$0xff]  ;;  %v175_v6 = vld [vmem:[#allocation8 + $0xe8] sm:$0xff]  ;;  %v213_v12 = vld [vmem:[#allocation2 + $0x18] sm:$0xff] }
  0x2c   :  { %454 = vmatpush.msra.mxu3 %v123_v44  ;;  %259 = vmatpush.msra.mxu0 %v90_v45  ;;  %v209_v3 = vld [vmem:[#allocation8 + $0x1f8] sm:$0xff]  ;;  %v207_v7 = vld [vmem:[#allocation8 + $0x1e8] sm:$0xff]  ;;  %v174_v8 = vld [vmem:[#allocation8 + $0xe0] sm:$0xff] }
  0x2d   :  { %390 = vmatpush.msra.mxu2 %v89_v47  ;;  %324 = vmatpush.msra.mxu1 %v122_v50  ;;  %v206_v9 = vld [vmem:[#allocation8 + $0x1e0] sm:$0xff]  ;;  %v173_v10 = vld [vmem:[#allocation8 + $0xd8] sm:$0xff]  ;;  %v212_v11 = vld [vmem:[#allocation2 + $0x10] sm:$0xff] }
  0x2e   :  { %455 = vmatpush.msra.mxu3 %v121_v48  ;;  %260 = vmatpush.msra.mxu0 %v88_v49  ;;  %v205_v13 = vld [vmem:[#allocation8 + $0x1d8] sm:$0xff]  ;;  %v172_v14 = vld [vmem:[#allocation8 + $0xd0] sm:$0xff]  ;;  %v171_v16 = vld [vmem:[#allocation8 + $0xc8] sm:$0xff] }
  0x2f   :  { %391 = vmatpush.msra.mxu2 %v87_v51  ;;  %325 = vmatpush.msra.mxu1 %v120_v54  ;;  %v204_v15 = vld [vmem:[#allocation8 + $0x1d0] sm:$0xff]  ;;  %v203_v17 = vld [vmem:[#allocation8 + $0x1c8] sm:$0xff]  ;;  %v170_v18 = vld [vmem:[#allocation8 + $0xc0] sm:$0xff] }
  0x30   :  { %456 = vmatpush.msra.mxu3 %v119_v52  ;;  %261 = vmatpush.msra.mxu0 %v86_v53  ;;  %v202_v19 = vld [vmem:[#allocation8 + $0x1c0] sm:$0xff]  ;;  %v169_v20 = vld [vmem:[#allocation8 + $0xb8] sm:$0xff]  ;;  %v168_v22 = vld [vmem:[#allocation8 + $0xb0] sm:$0xff] }
  0x31   :  { %392 = vmatpush.msra.mxu2 %v85_v55  ;;  %326 = vmatpush.msra.mxu1 %v118_v58  ;;  %v201_v21 = vld [vmem:[#allocation8 + $0x1b8] sm:$0xff]  ;;  %v215_v24 = vld [vmem:[#allocation2 + $0x28] sm:$0xff]  ;;  %v200_v25 = vld [vmem:[#allocation8 + $0x1b0] sm:$0xff] }
  0x32   :  { %457 = vmatpush.msra.mxu3 %v117_v56  ;;  %262 = vmatpush.msra.mxu0 %v84_v57  ;;  %v214_v23 = vld [vmem:[#allocation2 + $0x20] sm:$0xff]  ;;  %v167_v26 = vld [vmem:[#allocation8 + $0xa8] sm:$0xff]  ;;  %v217_v30 = vld [vmem:[#allocation2 + $0x38] sm:$0xff] }
  0x33   :  { %393 = vmatpush.msra.mxu2 %v83_v59  ;;  %327 = vmatpush.msra.mxu1 %v116_v0  ;;  %v199_v27 = vld [vmem:[#allocation8 + $0x1a8] sm:$0xff]  ;;  %v166_v28 = vld [vmem:[#allocation8 + $0xa0] sm:$0xff]  ;;  %v165_v32 = vld [vmem:[#allocation8 + $0x98] sm:$0xff] }
  0x34   :  { %458 = vmatpush.msra.mxu3 %v115_v60  ;;  %394 = vmatmul.f32.vlgmr.msra.gmra.mxu2 %v210_v61  ;;  %v216_v29 = vld [vmem:[#allocation2 + $0x30] sm:$0xff]  ;;  %v198_v31 = vld [vmem:[#allocation8 + $0x1a0] sm:$0xff]  ;;  %v197_v33 = vld [vmem:[#allocation8 + $0x198] sm:$0xff] }
  0x35   :  { %459 = vmatmul.f32.vlgmr.msra.gmra.mxu3 %v211_v62  ;;  %263 = vmatpush.msra.mxu0 %v82_v63  ;;  %v164_v34 = vld [vmem:[#allocation8 + $0x90] sm:$0xff]  ;;  %v218_v35 = vld [vmem:[#allocation2 + $0x40] sm:$0xff]  ;;  %v219_v36 = vld [vmem:[#allocation2 + $0x48] sm:$0xff] }
  0x36   :  { %264 = vmatmul.f32.vlgmr.msra.gmra.mxu0 %v210_v61  ;;  %676 = vmatpush.msrb.mxu2 %v177_v1  ;;  %v196_v37 = vld [vmem:[#allocation8 + $0x190] sm:$0xff]  ;;  %v163_v38 = vld [vmem:[#allocation8 + $0x88] sm:$0xff]  ;;  %v162_v40 = vld [vmem:[#allocation8 + $0x80] sm:$0xff] }
  0x37   :  { %328 = vmatpush.msra.mxu1 %v114_v2  ;;  %741 = vmatpush.msrb.mxu3 %v209_v3  ;;  %v195_v39 = vld [vmem:[#allocation8 + $0x188] sm:$0xff]  ;;  %v221_v42 = vld [vmem:[#allocation2 + $0x58] sm:$0xff]  ;;  %v194_v43 = vld [vmem:[#allocation8 + $0x180] sm:$0xff] }
  0x38   :  { %329 = vmatmul.f32.vlgmr.msra.gmra.mxu1 %v211_v62  ;;  %546 = vmatpush.msrb.mxu0 %v176_v4  ;;  %v220_v41 = vld [vmem:[#allocation2 + $0x50] sm:$0xff]  ;;  %v161_v44 = vld [vmem:[#allocation8 + $0x78] sm:$0xff]  ;;  %v223_v48 = vld [vmem:[#allocation2 + $0x68] sm:$0xff] }
  0x39   :  { %611 = vmatpush.msrb.mxu1 %v208_v5  ;;  %677 = vmatpush.msrb.mxu2 %v175_v6  ;;  %v193_v45 = vld [vmem:[#allocation8 + $0x178] sm:$0xff]  ;;  %v160_v46 = vld [vmem:[#allocation8 + $0x70] sm:$0xff]  ;;  %v159_v50 = vld [vmem:[#allocation8 + $0x68] sm:$0xff] }
  0x3a   :  { %742 = vmatpush.msrb.mxu3 %v207_v7  ;;  %547 = vmatpush.msrb.mxu0 %v174_v8  ;;  %v222_v47 = vld [vmem:[#allocation2 + $0x60] sm:$0xff]  ;;  %v192_v49 = vld [vmem:[#allocation8 + $0x170] sm:$0xff]  ;;  %v191_v51 = vld [vmem:[#allocation8 + $0x168] sm:$0xff] }
  0x3b   :  { %612 = vmatpush.msrb.mxu1 %v206_v9  ;;  %678 = vmatpush.msrb.mxu2 %v173_v10  ;;  %v158_v52 = vld [vmem:[#allocation8 + $0x60] sm:$0xff]  ;;  %v224_v53 = vld [vmem:[#allocation2 + $0x70] sm:$0xff]  ;;  %v225_v54 = vld [vmem:[#allocation2 + $0x78] sm:$0xff] }
  0x3c   :  { %397 = vmatmul.f32.gmra.mxu2 %v212_v11  ;;  %743 = vmatpush.msrb.mxu3 %v205_v13  ;;  %v190_v55 = vld [vmem:[#allocation8 + $0x160] sm:$0xff]  ;;  %v157_v56 = vld [vmem:[#allocation8 + $0x58] sm:$0xff]  ;;  %v156_v58 = vld [vmem:[#allocation8 + $0x50] sm:$0xff] }
  0x3d   :  { %462 = vmatmul.f32.gmra.mxu3 %v213_v12  ;;  %548 = vmatpush.msrb.mxu0 %v172_v14  ;;  %v189_v57 = vld [vmem:[#allocation8 + $0x158] sm:$0xff]  ;;  %v227_v60 = vld [vmem:[#allocation2 + $0x88] sm:$0xff]  ;;  %v188_v61 = vld [vmem:[#allocation8 + $0x150] sm:$0xff] }
  0x3e   :  { %267 = vmatmul.f32.gmra.mxu0 %v212_v11  ;;  %613 = vmatpush.msrb.mxu1 %v204_v15  ;;  %v226_v59 = vld [vmem:[#allocation2 + $0x80] sm:$0xff]  ;;  %v155_v62 = vld [vmem:[#allocation8 + $0x48] sm:$0xff]  ;;  %v229_v2 = vld [vmem:[#allocation2 + $0x98] sm:$0xff] }
  0x3f   :  { %679 = vmatpush.msrb.mxu2 %v171_v16  ;;  %744 = vmatpush.msrb.mxu3 %v203_v17  ;;  %v187_v63 = vld [vmem:[#allocation8 + $0x148] sm:$0xff]  ;;  %v154_v0 = vld [vmem:[#allocation8 + $0x40] sm:$0xff]  ;;  %v153_v4 = vld [vmem:[#allocation8 + $0x38] sm:$0xff] }
  0x40   :  { %332 = vmatmul.f32.gmra.mxu1 %v213_v12  ;;  %549 = vmatpush.msrb.mxu0 %v170_v18  ;;  %v228_v1 = vld [vmem:[#allocation2 + $0x90] sm:$0xff]  ;;  %v186_v3 = vld [vmem:[#allocation8 + $0x140] sm:$0xff]  ;;  %v185_v5 = vld [vmem:[#allocation8 + $0x138] sm:$0xff] }
  0x41   :  { %614 = vmatpush.msrb.mxu1 %v202_v19  ;;  %680 = vmatpush.msrb.mxu2 %v169_v20  ;;  %v152_v6 = vld [vmem:[#allocation8 + $0x30] sm:$0xff]  ;;  %v230_v7 = vld [vmem:[#allocation2 + $0xa0] sm:$0xff]  ;;  %v231_v8 = vld [vmem:[#allocation2 + $0xa8] sm:$0xff] }
  0x42   :  { %745 = vmatpush.msrb.mxu3 %v201_v21  ;;  %550 = vmatpush.msrb.mxu0 %v168_v22  ;;  %v184_v9 = vld [vmem:[#allocation8 + $0x130] sm:$0xff]  ;;  %v151_v10 = vld [vmem:[#allocation8 + $0x28] sm:$0xff]  ;;  %v150_v12 = vld [vmem:[#allocation8 + $0x20] sm:$0xff] }
  0x43   :  { %615 = vmatpush.msrb.mxu1 %v200_v25  ;;  %681 = vmatpush.msrb.mxu2 %v167_v26  ;;  %v183_v11 = vld [vmem:[#allocation8 + $0x128] sm:$0xff]  ;;  %v233_v14 = vld [vmem:[#allocation2 + $0xb8] sm:$0xff]  ;;  %v182_v15 = vld [vmem:[#allocation8 + $0x120] sm:$0xff] }
  0x44   :  { %400 = vmatmul.f32.gmra.mxu2 %v214_v23  ;;  %746 = vmatpush.msrb.mxu3 %v199_v27  ;;  %v232_v13 = vld [vmem:[#allocation2 + $0xb0] sm:$0xff]  ;;  %v149_v16 = vld [vmem:[#allocation8 + $0x18] sm:$0xff]  ;;  %v235_v22 = vld [vmem:[#allocation2 + $0xc8] sm:$0xff] }
  0x45   :  { %465 = vmatmul.f32.gmra.mxu3 %v215_v24  ;;  %551 = vmatpush.msrb.mxu0 %v166_v28  ;;  %v181_v17 = vld [vmem:[#allocation8 + $0x118] sm:$0xff]  ;;  %v148_v18 = vld [vmem:[#allocation8 + $0x10] sm:$0xff]  ;;  %v147_v20 = vld [vmem:[#allocation8 + $0x8] sm:$0xff] }
  0x46   :  { %270 = vmatmul.f32.gmra.mxu0 %v214_v23  ;;  %616 = vmatpush.msrb.mxu1 %v198_v31  ;;  %v180_v19 = vld [vmem:[#allocation8 + $0x110] sm:$0xff]  ;;  %v234_v21 = vld [vmem:[#allocation2 + $0xc0] sm:$0xff]  ;;  %v179_v23 = vld [vmem:[#allocation8 + $0x108] sm:$0xff] }
  0x47   :  { %682 = vmatpush.msrb.mxu2 %v165_v32  ;;  %747 = vmatpush.msrb.mxu3 %v197_v33  ;;  %v237_v25 = vld [vmem:[#allocation2 + $0xd8] sm:$0xff]  ;;  %v146_v26 = vld [vmem:[#allocation8] sm:$0xff]  ;;  %v242_v32 = vld [vmem:[#allocation7] sm:$0x3] }
  0x48   :  { %335 = vmatmul.f32.gmra.mxu1 %v215_v24  ;;  %552 = vmatpush.msrb.mxu0 %v164_v34  ;;  %v236_v24 = vld [vmem:[#allocation2 + $0xd0] sm:$0xff]  ;;  %v178_v27 = vld [vmem:[#allocation8 + $0x100] sm:$0xff]  ;;  %v241_v31 = vld [vmem:[#allocation2 + $0xf8] sm:$0xff]  ;;  %v1052_v33 = vperm.slane %v242_v32, 0 }
  0x49   :  { %617 = vmatpush.msrb.mxu1 %v196_v37  ;;  %683 = vmatpush.msrb.mxu2 %v163_v38  ;;  %v238_v28 = vld [vmem:[#allocation2 + $0xe0] sm:$0xff] }
  0x4a   :  { %748 = vmatpush.msrb.mxu3 %v195_v39  ;;  %553 = vmatpush.msrb.mxu0 %v162_v40 }
  0x4b   :  { %618 = vmatpush.msrb.mxu1 %v194_v43  ;;  %684 = vmatpush.msrb.mxu2 %v161_v44 }
  0x4c   :  { %403 = vmatmul.f32.gmra.mxu2 %v216_v29  ;;  %749 = vmatpush.msrb.mxu3 %v193_v45 }
  0x4d   :  { %468 = vmatmul.f32.gmra.mxu3 %v217_v30  ;;  %554 = vmatpush.msrb.mxu0 %v160_v46 }
  0x4e   :  { %273 = vmatmul.f32.gmra.mxu0 %v216_v29  ;;  %619 = vmatpush.msrb.mxu1 %v192_v49  ;;  %v239_v29 = vld [vmem:[#allocation2 + $0xe8] sm:$0xff] }
  0x4f   :  { %685 = vmatpush.msrb.mxu2 %v159_v50  ;;  %750 = vmatpush.msrb.mxu3 %v191_v51 }
  0x50   :  { %338 = vmatmul.f32.gmra.mxu1 %v217_v30  ;;  %555 = vmatpush.msrb.mxu0 %v158_v52  ;;  %v240_v30 = vld [vmem:[#allocation2 + $0xf0] sm:$0xff] }
  0x51   :  { %620 = vmatpush.msrb.mxu1 %v190_v55  ;;  %686 = vmatpush.msrb.mxu2 %v157_v56 }
  0x52   :  { %751 = vmatpush.msrb.mxu3 %v189_v57  ;;  %556 = vmatpush.msrb.mxu0 %v156_v58 }
  0x53   :  { %621 = vmatpush.msrb.mxu1 %v188_v61  ;;  %687 = vmatpush.msrb.mxu2 %v155_v62 }
  0x54   :  { %406 = vmatmul.f32.gmra.mxu2 %v218_v35  ;;  %752 = vmatpush.msrb.mxu3 %v187_v63 }
  0x55   :  { %471 = vmatmul.f32.gmra.mxu3 %v219_v36  ;;  %557 = vmatpush.msrb.mxu0 %v154_v0 }
  0x56   :  { %276 = vmatmul.f32.gmra.mxu0 %v218_v35  ;;  %622 = vmatpush.msrb.mxu1 %v186_v3 }
  0x57   :  { %688 = vmatpush.msrb.mxu2 %v153_v4  ;;  %753 = vmatpush.msrb.mxu3 %v185_v5 }
  0x58   :  { %341 = vmatmul.f32.gmra.mxu1 %v219_v36  ;;  %558 = vmatpush.msrb.mxu0 %v152_v6  ;;  %v1055_v36 = vperm.slane %v242_v32, 1 }
  0x59   :  { %623 = vmatpush.msrb.mxu1 %v184_v9  ;;  %689 = vmatpush.msrb.mxu2 %v151_v10 }
  0x5a   :  { %754 = vmatpush.msrb.mxu3 %v183_v11  ;;  %559 = vmatpush.msrb.mxu0 %v150_v12 }
  0x5b   :  { %624 = vmatpush.msrb.mxu1 %v182_v15  ;;  %690 = vmatpush.msrb.mxu2 %v149_v16 }
  0x5c   :  { %409 = vmatmul.f32.gmra.mxu2 %v220_v41  ;;  %755 = vmatpush.msrb.mxu3 %v181_v17 }
  0x5d   :  { %474 = vmatmul.f32.gmra.mxu3 %v221_v42  ;;  %560 = vmatpush.msrb.mxu0 %v148_v18 }
  0x5e   :  { %279 = vmatmul.f32.gmra.mxu0 %v220_v41  ;;  %625 = vmatpush.msrb.mxu1 %v180_v19 }
  0x5f   :  { %691 = vmatpush.msrb.mxu2 %v147_v20  ;;  %756 = vmatpush.msrb.mxu3 %v179_v23 }
  0x60   :  { %344 = vmatmul.f32.gmra.mxu1 %v221_v42  ;;  %561 = vmatpush.msrb.mxu0 %v146_v26 }
  0x61   :  { %626 = vmatpush.msrb.mxu1 %v178_v27 }
  0x64   :  { %412 = vmatmul.f32.gmra.mxu2 %v222_v47 }
  0x65   :  { %477 = vmatmul.f32.gmra.mxu3 %v223_v48 }
  0x66   :  { %282 = vmatmul.f32.gmra.mxu0 %v222_v47 }
  0x68   :  { %347 = vmatmul.f32.gmra.mxu1 %v223_v48 }
  0x6c   :  { %415 = vmatmul.f32.gmra.mxu2 %v224_v53 }
  0x6d   :  { %480 = vmatmul.f32.gmra.mxu3 %v225_v54 }
  0x6e   :  { %285 = vmatmul.f32.gmra.mxu0 %v224_v53 }
  0x70   :  { %350 = vmatmul.f32.gmra.mxu1 %v225_v54 }
  0x74   :  { %418 = vmatmul.f32.gmra.mxu2 %v226_v59 }
  0x75   :  { %483 = vmatmul.f32.gmra.mxu3 %v227_v60 }
  0x76   :  { %288 = vmatmul.f32.gmra.mxu0 %v226_v59 }
  0x78   :  { %353 = vmatmul.f32.gmra.mxu1 %v227_v60 }
  0x7c   :  { %421 = vmatmul.f32.gmra.mxu2 %v228_v1 }
  0x7d   :  { %486 = vmatmul.f32.gmra.mxu3 %v229_v2 }
  0x7e   :  { %291 = vmatmul.f32.gmra.mxu0 %v228_v1 }
  0x80   :  { %356 = vmatmul.f32.gmra.mxu1 %v229_v2 }
  0x84   :  { %424 = vmatmul.f32.gmra.mxu2 %v230_v7 }
  0x85   :  { %489 = vmatmul.f32.gmra.mxu3 %v231_v8 }
  0x86   :  { %294 = vmatmul.f32.gmra.mxu0 %v230_v7 }
  0x88   :  { %359 = vmatmul.f32.gmra.mxu1 %v231_v8 }
  0x8c   :  { %427 = vmatmul.f32.gmra.mxu2 %v232_v13 }
  0x8d   :  { %492 = vmatmul.f32.gmra.mxu3 %v233_v14 }
  0x8e   :  { %297 = vmatmul.f32.gmra.mxu0 %v232_v13 }
  0x90   :  { %362 = vmatmul.f32.gmra.mxu1 %v233_v14 }
  0x94   :  { %430 = vmatmul.f32.gmra.mxu2 %v234_v21 }
  0x95   :  { %495 = vmatmul.f32.gmra.mxu3 %v235_v22 }
  0x96   :  { %300 = vmatmul.f32.gmra.mxu0 %v234_v21 }
  0x98   :  { %365 = vmatmul.f32.gmra.mxu1 %v235_v22 }
  0x9c   :  { %433 = vmatmul.f32.gmra.mxu2 %v236_v24 }
  0x9d   :  { %498 = vmatmul.f32.gmra.mxu3 %v237_v25 }
  0x9e   :  { %303 = vmatmul.f32.gmra.mxu0 %v236_v24 }
  0xa0   :  { %368 = vmatmul.f32.gmra.mxu1 %v237_v25 }
  0xa4   :  { %436 = vmatmul.f32.gmra.mxu2 %v238_v28 }
  0xa5   :  { %501 = vmatmul.f32.gmra.mxu3 %v239_v29 }
  0xa6   :  { %306 = vmatmul.f32.gmra.mxu0 %v238_v28 }
  0xa8   :  { %371 = vmatmul.f32.gmra.mxu1 %v239_v29 }
  0xac   :  { %439 = vmatmul.f32.gmra.mxu2 %v240_v30 }
  0xad   :  { %504 = vmatmul.f32.gmra.mxu3 %v241_v31 }
  0xae   :  { %309 = vmatmul.f32.gmra.mxu0 %v240_v30 }
  0xb0   :  { %374 = vmatmul.f32.gmra.mxu1 %v241_v31 }
  0xb3   :  { %v265_v34 = vpop.f32.mrf.mxu0 }
  0xb4   :  { %v266_v35 = vadd.f32 %v265_v34, %v1052_v33 }
  0xb5   :  { %v330_v37 = vpop.f32.mrf.mxu1 }
  0xb6   :  { %v331_v38 = vadd.f32 %v330_v37, %v266_v35 }
  0xb7   :  { %v395_v39 = vpop.f32.mrf.mxu2 }
  0xb8   :  { %v460_v40 = vpop.f32.mrf.mxu3  ;;  %v508_v41 = vmax.f32 %v331_v38, 0.0  ;;  %v396_v42 = vadd.f32 %v395_v39, %v1055_v36 }
  0xba   :  { %v461_v43 = vadd.f32 %v460_v40, %v396_v42  ;;  %562 = vmatmul.f32.vlgmr.msrb.gmra.mxu0 %v508_v41  ;;  %692 = vmatmul.f32.vlgmr.msrb.gmra.mxu2 %v508_v41 }
  0xbb   :  { %v268_v44 = vpop.f32.mrf.mxu0 }
  0xbc   :  { %v509_v45 = vmax.f32 %v461_v43, 0.0  ;;  %v269_v46 = vadd.f32 %v268_v44, %v1052_v33 }
  0xbd   :  { %v333_v47 = vpop.f32.mrf.mxu1 }
  0xbe   :  { %627 = vmatmul.f32.vlgmr.msrb.gmra.mxu1 %v509_v45  ;;  %757 = vmatmul.f32.vlgmr.msrb.gmra.mxu3 %v509_v45  ;;  %v334_v48 = vadd.f32 %v333_v47, %v269_v46 }
  0xbf   :  { %v398_v49 = vpop.f32.mrf.mxu2 }
  0xc0   :  { %v463_v50 = vpop.f32.mrf.mxu3  ;;  %v399_v51 = vadd.f32 %v398_v49, %v1055_v36  ;;  %v510_v52 = vmax.f32 %v334_v48, 0.0 }
  0xc2   :  { %v464_v53 = vadd.f32 %v463_v50, %v399_v51  ;;  %565 = vmatmul.f32.gmra.mxu0 %v510_v52  ;;  %695 = vmatmul.f32.gmra.mxu2 %v510_v52 }
  0xc3   :  { %v271_v54 = vpop.f32.mrf.mxu0 }
  0xc4   :  { %v272_v55 = vadd.f32 %v271_v54, %v1052_v33  ;;  %v511_v56 = vmax.f32 %v464_v53, 0.0 }
  0xc5   :  { %v336_v57 = vpop.f32.mrf.mxu1 }
  0xc6   :  { %630 = vmatmul.f32.gmra.mxu1 %v511_v56  ;;  %760 = vmatmul.f32.gmra.mxu3 %v511_v56  ;;  %v337_v58 = vadd.f32 %v336_v57, %v272_v55 }
  0xc7   :  { %v401_v59 = vpop.f32.mrf.mxu2 }
  0xc8   :  { %v466_v60 = vpop.f32.mrf.mxu3  ;;  %v402_v61 = vadd.f32 %v401_v59, %v1055_v36  ;;  %v512_v62 = vmax.f32 %v337_v58, 0.0 }
  0xca   :  { %v467_v63 = vadd.f32 %v466_v60, %v402_v61  ;;  %568 = vmatmul.f32.gmra.mxu0 %v512_v62  ;;  %698 = vmatmul.f32.gmra.mxu2 %v512_v62 }
  0xcb   :  { %v274_v0 = vpop.f32.mrf.mxu0 }
  0xcc   :  { %v275_v1 = vadd.f32 %v274_v0, %v1052_v33  ;;  %v513_v2 = vmax.f32 %v467_v63, 0.0 }
  0xcd   :  { %v339_v3 = vpop.f32.mrf.mxu1 }
  0xce   :  { %633 = vmatmul.f32.gmra.mxu1 %v513_v2  ;;  %763 = vmatmul.f32.gmra.mxu3 %v513_v2  ;;  %v340_v4 = vadd.f32 %v339_v3, %v275_v1 }
  0xcf   :  { %v404_v5 = vpop.f32.mrf.mxu2 }
  0xd0   :  { %v469_v6 = vpop.f32.mrf.mxu3  ;;  %v405_v7 = vadd.f32 %v404_v5, %v1055_v36  ;;  %v514_v8 = vmax.f32 %v340_v4, 0.0 }
  0xd2   :  { %v470_v9 = vadd.f32 %v469_v6, %v405_v7  ;;  %571 = vmatmul.f32.gmra.mxu0 %v514_v8  ;;  %701 = vmatmul.f32.gmra.mxu2 %v514_v8 }
  0xd3   :  { %v277_v10 = vpop.f32.mrf.mxu0 }
  0xd4   :  { %v278_v11 = vadd.f32 %v277_v10, %v1052_v33  ;;  %v515_v12 = vmax.f32 %v470_v9, 0.0 }
  0xd5   :  { %v342_v13 = vpop.f32.mrf.mxu1 }
  0xd6   :  { %636 = vmatmul.f32.gmra.mxu1 %v515_v12  ;;  %766 = vmatmul.f32.gmra.mxu3 %v515_v12  ;;  %v343_v14 = vadd.f32 %v342_v13, %v278_v11 }
  0xd7   :  { %v407_v15 = vpop.f32.mrf.mxu2 }
  0xd8   :  { %v472_v16 = vpop.f32.mrf.mxu3  ;;  %v408_v17 = vadd.f32 %v407_v15, %v1055_v36  ;;  %v516_v18 = vmax.f32 %v343_v14, 0.0 }
  0xda   :  { %v473_v19 = vadd.f32 %v472_v16, %v408_v17  ;;  %574 = vmatmul.f32.gmra.mxu0 %v516_v18  ;;  %704 = vmatmul.f32.gmra.mxu2 %v516_v18 }
  0xdb   :  { %v280_v20 = vpop.f32.mrf.mxu0 }
  0xdc   :  { %v281_v21 = vadd.f32 %v280_v20, %v1052_v33  ;;  %v517_v22 = vmax.f32 %v473_v19, 0.0 }
  0xdd   :  { %v345_v23 = vpop.f32.mrf.mxu1 }
  0xde   :  { %639 = vmatmul.f32.gmra.mxu1 %v517_v22  ;;  %769 = vmatmul.f32.gmra.mxu3 %v517_v22  ;;  %v346_v24 = vadd.f32 %v345_v23, %v281_v21 }
  0xdf   :  { %v410_v25 = vpop.f32.mrf.mxu2 }
  0xe0   :  { %v475_v26 = vpop.f32.mrf.mxu3  ;;  %v411_v27 = vadd.f32 %v410_v25, %v1055_v36  ;;  %v518_v28 = vmax.f32 %v346_v24, 0.0 }
  0xe2   :  { %v476_v29 = vadd.f32 %v475_v26, %v411_v27  ;;  %577 = vmatmul.f32.gmra.mxu0 %v518_v28  ;;  %707 = vmatmul.f32.gmra.mxu2 %v518_v28 }
  0xe3   :  { %v283_v30 = vpop.f32.mrf.mxu0 }
  0xe4   :  { %v284_v31 = vadd.f32 %v283_v30, %v1052_v33  ;;  %v519_v32 = vmax.f32 %v476_v29, 0.0 }
  0xe5   :  { %v348_v34 = vpop.f32.mrf.mxu1 }
  0xe6   :  { %642 = vmatmul.f32.gmra.mxu1 %v519_v32  ;;  %772 = vmatmul.f32.gmra.mxu3 %v519_v32  ;;  %v349_v35 = vadd.f32 %v348_v34, %v284_v31 }
  0xe7   :  { %v413_v37 = vpop.f32.mrf.mxu2 }
  0xe8   :  { %v478_v38 = vpop.f32.mrf.mxu3  ;;  %v414_v39 = vadd.f32 %v413_v37, %v1055_v36  ;;  %v520_v40 = vmax.f32 %v349_v35, 0.0 }
  0xea   :  { %v479_v41 = vadd.f32 %v478_v38, %v414_v39  ;;  %580 = vmatmul.f32.gmra.mxu0 %v520_v40  ;;  %710 = vmatmul.f32.gmra.mxu2 %v520_v40 }
  0xeb   :  { %v286_v42 = vpop.f32.mrf.mxu0 }
  0xec   :  { %v287_v43 = vadd.f32 %v286_v42, %v1052_v33  ;;  %v521_v44 = vmax.f32 %v479_v41, 0.0 }
  0xed   :  { %v351_v45 = vpop.f32.mrf.mxu1 }
  0xee   :  { %645 = vmatmul.f32.gmra.mxu1 %v521_v44  ;;  %775 = vmatmul.f32.gmra.mxu3 %v521_v44  ;;  %v352_v46 = vadd.f32 %v351_v45, %v287_v43 }
  0xef   :  { %v416_v47 = vpop.f32.mrf.mxu2 }
  0xf0   :  { %v481_v48 = vpop.f32.mrf.mxu3  ;;  %v417_v49 = vadd.f32 %v416_v47, %v1055_v36  ;;  %v522_v50 = vmax.f32 %v352_v46, 0.0 }
  0xf2   :  { %v482_v51 = vadd.f32 %v481_v48, %v417_v49  ;;  %583 = vmatmul.f32.gmra.mxu0 %v522_v50  ;;  %713 = vmatmul.f32.gmra.mxu2 %v522_v50 }
  0xf3   :  { %v289_v52 = vpop.f32.mrf.mxu0 }
  0xf4   :  { %v290_v53 = vadd.f32 %v289_v52, %v1052_v33  ;;  %v523_v54 = vmax.f32 %v482_v51, 0.0 }
  0xf5   :  { %v354_v55 = vpop.f32.mrf.mxu1 }
  0xf6   :  { %648 = vmatmul.f32.gmra.mxu1 %v523_v54  ;;  %778 = vmatmul.f32.gmra.mxu3 %v523_v54  ;;  %v355_v56 = vadd.f32 %v354_v55, %v290_v53 }
  0xf7   :  { %v419_v57 = vpop.f32.mrf.mxu2 }
  0xf8   :  { %v484_v58 = vpop.f32.mrf.mxu3  ;;  %v524_v59 = vmax.f32 %v355_v56, 0.0  ;;  %v420_v60 = vadd.f32 %v419_v57, %v1055_v36 }
  0xfa   :  { %v485_v61 = vadd.f32 %v484_v58, %v420_v60  ;;  %586 = vmatmul.f32.gmra.mxu0 %v524_v59  ;;  %716 = vmatmul.f32.gmra.mxu2 %v524_v59 }
  0xfb   :  { %v292_v62 = vpop.f32.mrf.mxu0 }
  0xfc   :  { %v525_v63 = vmax.f32 %v485_v61, 0.0  ;;  %v293_v0 = vadd.f32 %v292_v62, %v1052_v33 }
  0xfd   :  { %v357_v1 = vpop.f32.mrf.mxu1 }
  0xfe   :  { %651 = vmatmul.f32.gmra.mxu1 %v525_v63  ;;  %781 = vmatmul.f32.gmra.mxu3 %v525_v63  ;;  %v358_v2 = vadd.f32 %v357_v1, %v293_v0 }
  0xff   :  { %v422_v3 = vpop.f32.mrf.mxu2 }
 0x100   :  { %v487_v4 = vpop.f32.mrf.mxu3  ;;  %v526_v5 = vmax.f32 %v358_v2, 0.0  ;;  %v423_v6 = vadd.f32 %v422_v3, %v1055_v36 }
 0x102   :  { %v488_v7 = vadd.f32 %v487_v4, %v423_v6  ;;  %589 = vmatmul.f32.gmra.mxu0 %v526_v5  ;;  %719 = vmatmul.f32.gmra.mxu2 %v526_v5  ;;  %v540_v5 = vld [vmem:[%s1137_s4] sm:$0x3] }
 0x103   :  { %v295_v8 = vpop.f32.mrf.mxu0 }
 0x104   :  { %v527_v9 = vmax.f32 %v488_v7, 0.0  ;;  %v296_v10 = vadd.f32 %v295_v8, %v1052_v33  ;;  %v1091_v8 = vperm.slane %v540_v5, 0 }
 0x105   :  { %v360_v11 = vpop.f32.mrf.mxu1 }
 0x106   :  { %654 = vmatmul.f32.gmra.mxu1 %v527_v9  ;;  %784 = vmatmul.f32.gmra.mxu3 %v527_v9  ;;  %v361_v12 = vadd.f32 %v360_v11, %v296_v10  ;;  %v1094_v10 = vperm.slane %v540_v5, 1 }
 0x107   :  { %v425_v13 = vpop.f32.mrf.mxu2 }
 0x108   :  { %v490_v14 = vpop.f32.mrf.mxu3  ;;  %v528_v15 = vmax.f32 %v361_v12, 0.0  ;;  %v426_v16 = vadd.f32 %v425_v13, %v1055_v36 }
 0x10a   :  { %v491_v17 = vadd.f32 %v490_v14, %v426_v16  ;;  %592 = vmatmul.f32.gmra.mxu0 %v528_v15  ;;  %722 = vmatmul.f32.gmra.mxu2 %v528_v15 }
 0x10b   :  { %v298_v18 = vpop.f32.mrf.mxu0 }
 0x10c   :  { %v529_v19 = vmax.f32 %v491_v17, 0.0  ;;  %v299_v20 = vadd.f32 %v298_v18, %v1052_v33 }
 0x10d   :  { %v363_v21 = vpop.f32.mrf.mxu1 }
 0x10e   :  { %657 = vmatmul.f32.gmra.mxu1 %v529_v19  ;;  %787 = vmatmul.f32.gmra.mxu3 %v529_v19  ;;  %v364_v22 = vadd.f32 %v363_v21, %v299_v20 }
 0x10f   :  { %v428_v23 = vpop.f32.mrf.mxu2 }
 0x110   :  { %v493_v24 = vpop.f32.mrf.mxu3  ;;  %v530_v25 = vmax.f32 %v364_v22, 0.0  ;;  %v429_v26 = vadd.f32 %v428_v23, %v1055_v36 }
 0x112   :  { %v494_v27 = vadd.f32 %v493_v24, %v429_v26  ;;  %595 = vmatmul.f32.gmra.mxu0 %v530_v25  ;;  %725 = vmatmul.f32.gmra.mxu2 %v530_v25 }
 0x113   :  { %v301_v28 = vpop.f32.mrf.mxu0 }
 0x114   :  { %v531_v29 = vmax.f32 %v494_v27, 0.0  ;;  %v302_v30 = vadd.f32 %v301_v28, %v1052_v33 }
 0x115   :  { %v366_v31 = vpop.f32.mrf.mxu1 }
 0x116   :  { %660 = vmatmul.f32.gmra.mxu1 %v531_v29  ;;  %790 = vmatmul.f32.gmra.mxu3 %v531_v29  ;;  %v367_v32 = vadd.f32 %v366_v31, %v302_v30 }
 0x117   :  { %v431_v34 = vpop.f32.mrf.mxu2 }
 0x118   :  { %v496_v35 = vpop.f32.mrf.mxu3  ;;  %v532_v37 = vmax.f32 %v367_v32, 0.0  ;;  %v432_v38 = vadd.f32 %v431_v34, %v1055_v36 }
 0x11a   :  { %v497_v39 = vadd.f32 %v496_v35, %v432_v38  ;;  %598 = vmatmul.f32.gmra.mxu0 %v532_v37  ;;  %728 = vmatmul.f32.gmra.mxu2 %v532_v37 }
 0x11b   :  { %v304_v40 = vpop.f32.mrf.mxu0 }
 0x11c   :  { %v533_v41 = vmax.f32 %v497_v39, 0.0  ;;  %v305_v42 = vadd.f32 %v304_v40, %v1052_v33 }
 0x11d   :  { %v369_v43 = vpop.f32.mrf.mxu1 }
 0x11e   :  { %663 = vmatmul.f32.gmra.mxu1 %v533_v41  ;;  %793 = vmatmul.f32.gmra.mxu3 %v533_v41  ;;  %v370_v44 = vadd.f32 %v369_v43, %v305_v42 }
 0x11f   :  { %v434_v45 = vpop.f32.mrf.mxu2 }
 0x120   :  { %v499_v46 = vpop.f32.mrf.mxu3  ;;  %v534_v47 = vmax.f32 %v370_v44, 0.0  ;;  %v435_v48 = vadd.f32 %v434_v45, %v1055_v36 }
 0x122   :  { %v500_v49 = vadd.f32 %v499_v46, %v435_v48  ;;  %601 = vmatmul.f32.gmra.mxu0 %v534_v47  ;;  %731 = vmatmul.f32.gmra.mxu2 %v534_v47 }
 0x123   :  { %v307_v50 = vpop.f32.mrf.mxu0 }
 0x124   :  { %v535_v51 = vmax.f32 %v500_v49, 0.0  ;;  %v308_v52 = vadd.f32 %v307_v50, %v1052_v33 }
 0x125   :  { %v372_v53 = vpop.f32.mrf.mxu1 }
 0x126   :  { %666 = vmatmul.f32.gmra.mxu1 %v535_v51  ;;  %796 = vmatmul.f32.gmra.mxu3 %v535_v51  ;;  %v373_v54 = vadd.f32 %v372_v53, %v308_v52 }
 0x127   :  { %v437_v55 = vpop.f32.mrf.mxu2 }
 0x128   :  { %v502_v56 = vpop.f32.mrf.mxu3  ;;  %v536_v57 = vmax.f32 %v373_v54, 0.0  ;;  %v438_v58 = vadd.f32 %v437_v55, %v1055_v36 }
 0x12a   :  { %v503_v59 = vadd.f32 %v502_v56, %v438_v58  ;;  %604 = vmatmul.f32.gmra.mxu0 %v536_v57  ;;  %734 = vmatmul.f32.gmra.mxu2 %v536_v57 }
 0x12b   :  { %v310_v60 = vpop.f32.mrf.mxu0 }
 0x12c   :  { %v537_v61 = vmax.f32 %v503_v59, 0.0  ;;  %v311_v62 = vadd.f32 %v310_v60, %v1052_v33 }
 0x12d   :  { %v375_v63 = vpop.f32.mrf.mxu1 }
 0x12e   :  { %669 = vmatmul.f32.gmra.mxu1 %v537_v61  ;;  %799 = vmatmul.f32.gmra.mxu3 %v537_v61  ;;  %v376_v0 = vadd.f32 %v375_v63, %v311_v62 }
 0x12f   :  { %v440_v1 = vpop.f32.mrf.mxu2 }
 0x130   :  { %v505_v2 = vpop.f32.mrf.mxu3  ;;  %v538_v3 = vmax.f32 %v376_v0, 0.0  ;;  %v441_v4 = vadd.f32 %v440_v1, %v1055_v36 }
 0x132   :  { %v506_v6 = vadd.f32 %v505_v2, %v441_v4  ;;  %607 = vmatmul.f32.gmra.mxu0 %v538_v3  ;;  %737 = vmatmul.f32.gmra.mxu2 %v538_v3 }
 0x134   :  { %v539_v7 = vmax.f32 %v506_v6, 0.0 }
 0x136   :  { %672 = vmatmul.f32.gmra.mxu1 %v539_v7  ;;  %802 = vmatmul.f32.gmra.mxu3 %v539_v7 }
 0x137   :  { %v563_v33 = vpop.f32.mrf.mxu0 }
 0x138   :  { %v564_v9 = vadd.f32 %v563_v33, %v1091_v8 }
 0x13b   :  { %v628_v11 = vpop.f32.mrf.mxu1 }
 0x13c   :  { %v629_v12 = vadd.f32 %v628_v11, %v564_v9 }
 0x13d   :  { %v693_v36 = vpop.f32.mrf.mxu2 }
 0x13e   :  { %806 = vst [vmem:[#allocation10] sm:$0xff] %v629_v12  ;;  %v694_v13 = vadd.f32 %v693_v36, %v1094_v10 }
 0x13f   :  { %v566_v14 = vpop.f32.mrf.mxu0 }
 0x140   :  { %v567_v15 = vadd.f32 %v566_v14, %v1091_v8 }
 0x141   :  { %v758_v16 = vpop.f32.mrf.mxu3 }
 0x142   :  { %v759_v17 = vadd.f32 %v758_v16, %v694_v13 }
 0x143   :  { %v631_v18 = vpop.f32.mrf.mxu1 }
 0x144   :  { %807 = vst [vmem:[#allocation10 + $0x8] sm:$0xff] %v759_v17  ;;  %v632_v19 = vadd.f32 %v631_v18, %v567_v15 }
 0x145   :  { %v696_v20 = vpop.f32.mrf.mxu2 }
 0x146   :  { %808 = vst [vmem:[#allocation10 + $0x10] sm:$0xff] %v632_v19  ;;  %v697_v21 = vadd.f32 %v696_v20, %v1094_v10 }
 0x147   :  { %v569_v22 = vpop.f32.mrf.mxu0 }
 0x148   :  { %v570_v23 = vadd.f32 %v569_v22, %v1091_v8 }
 0x149   :  { %v761_v24 = vpop.f32.mrf.mxu3 }
 0x14a   :  { %v762_v25 = vadd.f32 %v761_v24, %v697_v21 }
 0x14b   :  { %v634_v26 = vpop.f32.mrf.mxu1 }
 0x14c   :  { %809 = vst [vmem:[#allocation10 + $0x18] sm:$0xff] %v762_v25  ;;  %v635_v27 = vadd.f32 %v634_v26, %v570_v23 }
 0x14d   :  { %v699_v28 = vpop.f32.mrf.mxu2 }
 0x14e   :  { %810 = vst [vmem:[#allocation10 + $0x20] sm:$0xff] %v635_v27  ;;  %v700_v29 = vadd.f32 %v699_v28, %v1094_v10 }
 0x14f   :  { %v572_v30 = vpop.f32.mrf.mxu0 }
 0x150   :  { %v573_v31 = vadd.f32 %v572_v30, %v1091_v8 }
 0x151   :  { %v764_v32 = vpop.f32.mrf.mxu3 }
 0x152   :  { %v765_v34 = vadd.f32 %v764_v32, %v700_v29 }
 0x153   :  { %v637_v35 = vpop.f32.mrf.mxu1 }
 0x154   :  { %811 = vst [vmem:[#allocation10 + $0x28] sm:$0xff] %v765_v34  ;;  %v638_v37 = vadd.f32 %v637_v35, %v573_v31 }
 0x155   :  { %v702_v38 = vpop.f32.mrf.mxu2 }
 0x156   :  { %812 = vst [vmem:[#allocation10 + $0x30] sm:$0xff] %v638_v37  ;;  %v703_v39 = vadd.f32 %v702_v38, %v1094_v10 }
 0x157   :  { %v575_v40 = vpop.f32.mrf.mxu0 }
 0x158   :  { %v576_v41 = vadd.f32 %v575_v40, %v1091_v8 }
 0x159   :  { %v767_v42 = vpop.f32.mrf.mxu3 }
 0x15a   :  { %v768_v43 = vadd.f32 %v767_v42, %v703_v39 }
 0x15b   :  { %v640_v44 = vpop.f32.mrf.mxu1 }
 0x15c   :  { %813 = vst [vmem:[#allocation10 + $0x38] sm:$0xff] %v768_v43  ;;  %v641_v45 = vadd.f32 %v640_v44, %v576_v41 }
 0x15d   :  { %v705_v46 = vpop.f32.mrf.mxu2 }
 0x15e   :  { %814 = vst [vmem:[#allocation10 + $0x40] sm:$0xff] %v641_v45  ;;  %v706_v47 = vadd.f32 %v705_v46, %v1094_v10 }
 0x15f   :  { %v578_v48 = vpop.f32.mrf.mxu0 }
 0x160   :  { %v579_v49 = vadd.f32 %v578_v48, %v1091_v8 }
 0x161   :  { %v770_v50 = vpop.f32.mrf.mxu3 }
 0x162   :  { %v771_v51 = vadd.f32 %v770_v50, %v706_v47 }
 0x163   :  { %v643_v52 = vpop.f32.mrf.mxu1 }
 0x164   :  { %815 = vst [vmem:[#allocation10 + $0x48] sm:$0xff] %v771_v51  ;;  %v644_v53 = vadd.f32 %v643_v52, %v579_v49 }
 0x165   :  { %v708_v54 = vpop.f32.mrf.mxu2 }
 0x166   :  { %816 = vst [vmem:[#allocation10 + $0x50] sm:$0xff] %v644_v53  ;;  %v709_v55 = vadd.f32 %v708_v54, %v1094_v10 }
 0x167   :  { %v581_v56 = vpop.f32.mrf.mxu0 }
 0x168   :  { %v582_v57 = vadd.f32 %v581_v56, %v1091_v8 }
 0x169   :  { %v773_v58 = vpop.f32.mrf.mxu3 }
 0x16a   :  { %v774_v59 = vadd.f32 %v773_v58, %v709_v55 }
 0x16b   :  { %v646_v60 = vpop.f32.mrf.mxu1 }
 0x16c   :  { %817 = vst [vmem:[#allocation10 + $0x58] sm:$0xff] %v774_v59  ;;  %v647_v61 = vadd.f32 %v646_v60, %v582_v57 }
 0x16d   :  { %v711_v62 = vpop.f32.mrf.mxu2 }
 0x16e   :  { %818 = vst [vmem:[#allocation10 + $0x60] sm:$0xff] %v647_v61  ;;  %v712_v63 = vadd.f32 %v711_v62, %v1094_v10 }
 0x16f   :  { %v584_v0 = vpop.f32.mrf.mxu0 }
 0x170   :  { %v585_v1 = vadd.f32 %v584_v0, %v1091_v8 }
 0x171   :  { %v776_v2 = vpop.f32.mrf.mxu3 }
 0x172   :  { %v777_v3 = vadd.f32 %v776_v2, %v712_v63 }
 0x173   :  { %v649_v4 = vpop.f32.mrf.mxu1 }
 0x174   :  { %819 = vst [vmem:[#allocation10 + $0x68] sm:$0xff] %v777_v3  ;;  %v650_v5 = vadd.f32 %v649_v4, %v585_v1 }
 0x175   :  { %v714_v6 = vpop.f32.mrf.mxu2 }
 0x176   :  { %820 = vst [vmem:[#allocation10 + $0x70] sm:$0xff] %v650_v5  ;;  %v715_v7 = vadd.f32 %v714_v6, %v1094_v10 }
 0x177   :  { %v587_v33 = vpop.f32.mrf.mxu0 }
 0x178   :  { %v588_v9 = vadd.f32 %v587_v33, %v1091_v8 }
 0x179   :  { %v779_v11 = vpop.f32.mrf.mxu3 }
 0x17a   :  { %v780_v12 = vadd.f32 %v779_v11, %v715_v7 }
 0x17b   :  { %v652_v36 = vpop.f32.mrf.mxu1 }
 0x17c   :  { %821 = vst [vmem:[#allocation10 + $0x78] sm:$0xff] %v780_v12  ;;  %v653_v13 = vadd.f32 %v652_v36, %v588_v9 }
 0x17d   :  { %v717_v14 = vpop.f32.mrf.mxu2 }
 0x17e   :  { %822 = vst [vmem:[#allocation10 + $0x80] sm:$0xff] %v653_v13  ;;  %v718_v15 = vadd.f32 %v717_v14, %v1094_v10 }
 0x17f   :  { %v590_v16 = vpop.f32.mrf.mxu0 }
 0x180   :  { %v591_v17 = vadd.f32 %v590_v16, %v1091_v8 }
 0x181   :  { %v782_v18 = vpop.f32.mrf.mxu3 }
 0x182   :  { %v783_v19 = vadd.f32 %v782_v18, %v718_v15 }
 0x183   :  { %v655_v20 = vpop.f32.mrf.mxu1 }
 0x184   :  { %823 = vst [vmem:[#allocation10 + $0x88] sm:$0xff] %v783_v19  ;;  %v656_v21 = vadd.f32 %v655_v20, %v591_v17 }
 0x185   :  { %v720_v22 = vpop.f32.mrf.mxu2 }
 0x186   :  { %824 = vst [vmem:[#allocation10 + $0x90] sm:$0xff] %v656_v21  ;;  %v721_v23 = vadd.f32 %v720_v22, %v1094_v10 }
 0x187   :  { %v593_v24 = vpop.f32.mrf.mxu0 }
 0x188   :  { %v594_v25 = vadd.f32 %v593_v24, %v1091_v8 }
 0x189   :  { %v785_v26 = vpop.f32.mrf.mxu3 }
 0x18a   :  { %v786_v27 = vadd.f32 %v785_v26, %v721_v23 }
 0x18b   :  { %v658_v28 = vpop.f32.mrf.mxu1 }
 0x18c   :  { %825 = vst [vmem:[#allocation10 + $0x98] sm:$0xff] %v786_v27  ;;  %v659_v29 = vadd.f32 %v658_v28, %v594_v25 }
 0x18d   :  { %v723_v30 = vpop.f32.mrf.mxu2 }
 0x18e   :  { %826 = vst [vmem:[#allocation10 + $0xa0] sm:$0xff] %v659_v29  ;;  %v724_v31 = vadd.f32 %v723_v30, %v1094_v10 }
 0x18f   :  { %v596_v32 = vpop.f32.mrf.mxu0 }
 0x190   :  { %v597_v34 = vadd.f32 %v596_v32, %v1091_v8 }
 0x191   :  { %v788_v35 = vpop.f32.mrf.mxu3 }
 0x192   :  { %v789_v37 = vadd.f32 %v788_v35, %v724_v31 }
 0x193   :  { %v661_v38 = vpop.f32.mrf.mxu1 }
 0x194   :  { %827 = vst [vmem:[#allocation10 + $0xa8] sm:$0xff] %v789_v37  ;;  %v662_v39 = vadd.f32 %v661_v38, %v597_v34 }
 0x195   :  { %v726_v40 = vpop.f32.mrf.mxu2 }
 0x196   :  { %828 = vst [vmem:[#allocation10 + $0xb0] sm:$0xff] %v662_v39  ;;  %v727_v41 = vadd.f32 %v726_v40, %v1094_v10 }
 0x197   :  { %v599_v42 = vpop.f32.mrf.mxu0 }
 0x198   :  { %v600_v43 = vadd.f32 %v599_v42, %v1091_v8 }
 0x199   :  { %v791_v44 = vpop.f32.mrf.mxu3 }
 0x19a   :  { %v792_v45 = vadd.f32 %v791_v44, %v727_v41 }
 0x19b   :  { %v664_v46 = vpop.f32.mrf.mxu1 }
 0x19c   :  { %829 = vst [vmem:[#allocation10 + $0xb8] sm:$0xff] %v792_v45  ;;  %v665_v47 = vadd.f32 %v664_v46, %v600_v43 }
 0x19d   :  { %v729_v48 = vpop.f32.mrf.mxu2 }
 0x19e   :  { %830 = vst [vmem:[#allocation10 + $0xc0] sm:$0xff] %v665_v47  ;;  %v730_v49 = vadd.f32 %v729_v48, %v1094_v10 }
 0x19f   :  { %v602_v50 = vpop.f32.mrf.mxu0 }
 0x1a0   :  { %v603_v51 = vadd.f32 %v602_v50, %v1091_v8 }
 0x1a1   :  { %v794_v52 = vpop.f32.mrf.mxu3 }
 0x1a2   :  { %v795_v53 = vadd.f32 %v794_v52, %v730_v49 }
 0x1a3   :  { %v667_v54 = vpop.f32.mrf.mxu1 }
 0x1a4   :  { %831 = vst [vmem:[#allocation10 + $0xc8] sm:$0xff] %v795_v53  ;;  %v668_v55 = vadd.f32 %v667_v54, %v603_v51 }
 0x1a5   :  { %v732_v56 = vpop.f32.mrf.mxu2 }
 0x1a6   :  { %832 = vst [vmem:[#allocation10 + $0xd0] sm:$0xff] %v668_v55  ;;  %v733_v57 = vadd.f32 %v732_v56, %v1094_v10 }
 0x1a7   :  { %v605_v58 = vpop.f32.mrf.mxu0 }
 0x1a8   :  { %v606_v59 = vadd.f32 %v605_v58, %v1091_v8 }
 0x1a9   :  { %v797_v60 = vpop.f32.mrf.mxu3 }
 0x1aa   :  { %v798_v61 = vadd.f32 %v797_v60, %v733_v57 }
 0x1ab   :  { %v670_v62 = vpop.f32.mrf.mxu1 }
 0x1ac   :  { %833 = vst [vmem:[#allocation10 + $0xd8] sm:$0xff] %v798_v61  ;;  %v671_v63 = vadd.f32 %v670_v62, %v606_v59 }
 0x1ad   :  { %v735_v0 = vpop.f32.mrf.mxu2 }
 0x1ae   :  { %834 = vst [vmem:[#allocation10 + $0xe0] sm:$0xff] %v671_v63  ;;  %v736_v1 = vadd.f32 %v735_v0, %v1094_v10 }
 0x1af   :  { %v608_v2 = vpop.f32.mrf.mxu0 }
 0x1b0   :  { %v609_v3 = vadd.f32 %v608_v2, %v1091_v8 }
 0x1b1   :  { %v800_v4 = vpop.f32.mrf.mxu3 }
 0x1b2   :  { %v801_v5 = vadd.f32 %v800_v4, %v736_v1 }
 0x1b3   :  { %v673_v6 = vpop.f32.mrf.mxu1 }
 0x1b4   :  { %835 = vst [vmem:[#allocation10 + $0xe8] sm:$0xff] %v801_v5  ;;  %v674_v7 = vadd.f32 %v673_v6, %v609_v3 }
 0x1b5   :  { %v738_v33 = vpop.f32.mrf.mxu2 }
 0x1b6   :  { %836 = vst [vmem:[#allocation10 + $0xf0] sm:$0xff] %v674_v7  ;;  %v739_v9 = vadd.f32 %v738_v33, %v1094_v10 }
 0x1b9   :  { %v803_v11 = vpop.f32.mrf.mxu3 }
 0x1ba   :  { %v804_v12 = vadd.f32 %v803_v11, %v739_v9 }
 0x1bc   :  { %837 = vst [vmem:[#allocation10 + $0xf8] sm:$0xff] %v804_v12 }
 0x1bd   :  { %841 = vsyncadd [#allocation4], 3328  ;;  %s844_s14 = sshll.u32 %s1138_s5, 4  ;;  %s1000_s15 = smov [#allocation10]   ;;  %s845_s14 = int_to_ptr.hbm [resolvable:$true] %s844_s14 }
 0x1be   :  { %s842_s16 = sshll.u32 %s1000_s15, 4  ;;  %s843_s16 = int_to_ptr.vmem [resolvable:$true] %s842_s16 }
 0x1bf   :  { %850 = dma.vmem_to_hbm [thread:$0]  %s843_s16, 768, %s845_s14, [#allocation4], %s995_s26, %s995_s26, %s996_s27  }
 0x1c0   :  { %992 = dma.done.wait [#allocation4], 4096  }
 0x1c1   :  { %993 = vsyncadd [#allocation4], 4294963200 }
 0x1c2   :  { %855 = vsyncpa [#allocation3], 1 }
 0x1c3   :  { %856 = vsyncpa [#allocation6], 1 }
 0x1c4   :  { %857 = vsyncpa [#allocation9], 1 }
 0x1c5   :  { %858 = vsyncpa [#allocation4], 1 }

</bundles_post_ra>
